<compile_context>
chip_gen: v7x
topology: tpu7x:2x2x1
jax: 0.10.0
libtpu: 0.0.40
codegen_flags: <defaults>
</compile_context>

<pallas_src>
import math
from typing import NamedTuple

import jax
import jax.numpy as jnp
from jax.experimental import pallas as pl
from jax.experimental.pallas import tpu as pltpu


def _round_up(x: int, m: int) -> int:
    return (x + m - 1) // m * m


def _usable_vmem_bytes() -> int:
    """Per-core VMEM budget with headroom for compiler scratch/semaphores."""
    try:
        cap = int(pltpu.get_tpu_info().vmem_capacity_bytes)
    except Exception:
        cap = 64 * 1024 * 1024  # conservative (v7x-sized) fallback
    # ~112 MiB on 128-MiB v5e/v6e, ~56 MiB on 64-MiB v7x.
    return cap * 7 // 8


class AdaptParams(NamedTuple):
    wt_padded: jax.Array   # [Kp, Np] bf16, pre-transposed, 128-lane padded
    b_padded: jax.Array    # [1, Np]  fp32
    h_in: int
    h_out: int


def prepare_adapt_params(weight, bias, *, compute_dtype=jnp.bfloat16) -> AdaptParams:
    """One-time parameter prep (do at load time, NOT per forward).

    weight: [H_out, H_in]  (PyTorch nn.Linear layout);  bias: [H_out].
    """
    h_out, h_in = weight.shape
    kp = _round_up(h_in, 128)
    np_ = _round_up(h_out, 128)
    wt = weight.T.astype(compute_dtype)          # transpose + cast exactly once
    wt_padded = jnp.pad(wt, ((0, kp - h_in), (0, np_ - h_out)))
    b_padded = jnp.pad(bias.astype(jnp.float32), (0, np_ - h_out)).reshape(1, np_)
    return AdaptParams(wt_padded, b_padded, h_in, h_out)


# ------------------------------ kernels ------------------------------------


def _adapt_kernel_resident(x_ref, wt_ref, b_ref, o_ref):
    # bf16 MXU matmul with fp32 accumulation; bias add + downcast on the VPU.
    acc = jnp.dot(x_ref[...].astype(wt_ref.dtype), wt_ref[...],
                  preferred_element_type=jnp.float32)
    o_ref[...] = (acc + b_ref[...]).astype(o_ref.dtype)


def _adapt_kernel_tiled(x_ref, wt_ref, b_ref, o_ref, acc_ref):
    k = pl.program_id(2)

    @pl.when(k == 0)
    def _init():
        acc_ref[...] = jnp.zeros_like(acc_ref)

    acc_ref[...] += jnp.dot(x_ref[...].astype(wt_ref.dtype), wt_ref[...],
                            preferred_element_type=jnp.float32)

    @pl.when(k == pl.num_programs(2) - 1)
    def _finalize():
        o_ref[...] = (acc_ref[...] + b_ref[...]).astype(o_ref.dtype)


# --------------------------- pallas_call builders ---------------------------


def _call_resident(x2d, wt_padded, b_padded, out_dtype, tm, usable_vmem,
                   *, single_buffer_consts):
    tokens_pad, kp = x2d.shape
    np_ = wt_padded.shape[1]
    grid = (pl.cdiv(tokens_pad, tm),)

    x_it = x2d.dtype.itemsize
    w_it = wt_padded.dtype.itemsize
    out_it = jnp.dtype(out_dtype).itemsize

    if single_buffer_consts:
        # Constant block index -> stays VMEM resident; one buffer is enough.
        w_spec = pl.BlockSpec((kp, np_), lambda i: (0, 0),
                              pipeline_mode=pl.Buffered(1))
        b_spec = pl.BlockSpec((1, np_), lambda i: (0, 0),
                              pipeline_mode=pl.Buffered(1))
        w_bufs = 1
    else:
        w_spec = pl.BlockSpec((kp, np_), lambda i: (0, 0))
        b_spec = pl.BlockSpec((1, np_), lambda i: (0, 0))
        w_bufs = 2

    vmem_est = (2 * tm * kp * x_it            # double-buffered x tiles
                + 2 * tm * np_ * out_it       # double-buffered out tiles
                + w_bufs * kp * np_ * w_it    # resident bf16 weight
                + w_bufs * 8 * np_ * 4)       # bias (padded to 8 sublanes)
    vmem_limit = int(min(usable_vmem, max(5 * vmem_est // 4, 16 * 1024 * 1024)))

    cost = pl.CostEstimate(
        flops=2 * tokens_pad * kp * np_,
        transcendentals=0,
        bytes_accessed=(tokens_pad * kp * x_it + kp * np_ * w_it
                        + np_ * 4 + tokens_pad * np_ * out_it))

    # TODO(synk): for small Kp/Np (memory-bound) sweep pipeline_mode=
    # pl.Buffered(3) on the x spec to hide exposed DMA latency at step edges.
    return pl.pallas_call(
        _adapt_kernel_resident,
        out_shape=jax.ShapeDtypeStruct((tokens_pad, np_), out_dtype),
        grid_spec=pltpu.PrefetchScalarGridSpec(
            num_scalar_prefetch=0,
            grid=grid,
            in_specs=[
                pl.BlockSpec((tm, kp), lambda i: (i, 0)),   # marches over tokens
                w_spec,
                b_spec,
            ],
            out_specs=pl.BlockSpec((tm, np_), lambda i: (i, 0)),
        ),
        compiler_params=pltpu.CompilerParams(
            dimension_semantics=("parallel",),  # shard token tiles over TCs (v7x)
            vmem_limit_bytes=vmem_limit,
        ),
        cost_estimate=cost,
    )(x2d, wt_padded, b_padded)


def _call_tiled(x2d, wt_padded, b_padded, out_dtype, tm, tn, tk, usable_vmem):
    tokens_pad, kp = x2d.shape
    np_ = wt_padded.shape[1]
    # tn/tk must evenly divide the padded dims (no ragged reduction blocks);
    # kp/np_ are multiples of 128 so the gcd stays 128-aligned.
    tn = math.gcd(tn, np_)
    tk = math.gcd(tk, kp)
    tm = max(16, min(tm, 256))   # keep the per-step working set a few MiB

    grid = (pl.cdiv(tokens_pad, tm), np_ // tn, kp // tk)

    x_it = x2d.dtype.itemsize
    w_it = wt_padded.dtype.itemsize
    out_it = jnp.dtype(out_dtype).itemsize

    vmem_est = (2 * tm * tk * x_it + 2 * tk * tn * w_it
                + 2 * tm * tn * out_it + 2 * 8 * tn * 4
                + tm * tn * 4)                # fp32 accumulator scratch
    vmem_limit = int(min(usable_vmem, max(5 * vmem_est // 4, 16 * 1024 * 1024)))

    cost = pl.CostEstimate(
        flops=2 * tokens_pad * kp * np_,
        transcendentals=0,
        bytes_accessed=(tokens_pad * kp * x_it * (np_ // tn)
                        + kp * np_ * w_it * grid[0]
                        + np_ * 4 + tokens_pad * np_ * out_it))

    return pl.pallas_call(
        _adapt_kernel_tiled,
        out_shape=jax.ShapeDtypeStruct((tokens_pad, np_), out_dtype),
        grid_spec=pltpu.PrefetchScalarGridSpec(
            num_scalar_prefetch=0,
            grid=grid,
            in_specs=[
                pl.BlockSpec((tm, tk), lambda i, j, k: (i, k)),
                pl.BlockSpec((tk, tn), lambda i, j, k: (k, j)),
                pl.BlockSpec((1, tn), lambda i, j, k: (0, j)),
            ],
            out_specs=pl.BlockSpec((tm, tn), lambda i, j, k: (i, j)),
            scratch_shapes=[pltpu.VMEM((tm, tn), jnp.float32)],
        ),
        compiler_params=pltpu.CompilerParams(
            dimension_semantics=("parallel", "parallel", "arbitrary"),
            vmem_limit_bytes=vmem_limit,
        ),
        cost_estimate=cost,
    )(x2d, wt_padded, b_padded)


# ------------------------------- wrapper ------------------------------------

# Below this many (padded) MXU FLOPs, fixed pallas_call overhead + lane-padding
# waste make plain XLA strictly faster (e.g. the configured H=32 AdaptLayer).
_MIN_PALLAS_FLOPS = 1 << 24


def adapt_layer(x, params: AdaptParams, *, tm=1024, tn=512, tk=512,
                force_pallas=False, force_nk_tiling=False):
    """y = x @ weight.T + bias   (nn.Linear semantics)."""
    h_in, h_out = params.h_in, params.h_out
    kp, np_ = params.wt_padded.shape
    orig_shape = x.shape
    assert orig_shape[-1] == h_in, (orig_shape, h_in)

    x2d = x.reshape(-1, h_in)
    tokens = x2d.shape[0]

    # Tiny-problem fallback: skip Pallas, let XLA do it (same bf16 weight).
    if not force_pallas and 2 * tokens * kp * np_ < _MIN_PALLAS_FLOPS:
        w = params.wt_padded[:h_in, :h_out].astype(jnp.float32)
        b = params.b_padded[0, :h_out]
        y = (x2d.astype(jnp.float32) @ w + b).astype(x.dtype)
        return y.reshape(*orig_shape[:-1], h_out)

    # Pad lanes (K) to match the padded weight and tokens to bf16 sublane
    # packing (16) only -- NOT to a multiple of tm; the ragged last token tile
    # is handled (masked) by the Pallas pipeline and sliced off below.
    tokens_pad = _round_up(tokens, 16)
    if kp != h_in or tokens_pad != tokens:
        x2d = jnp.pad(x2d, ((0, tokens_pad - tokens), (0, kp - h_in)))

    # Token tile: multiple of 16; halve until there are >= 2 grid steps so
    # both v7x TensorCores get work (harmless on single-TC v5e/v6e).
    tm = max(16, _round_up(min(tm, tokens_pad), 16))
    while tm >= 32 and pl.cdiv(tokens_pad, tm) < 2:
        tm = max(16, _round_up(tm // 2, 16))

    usable_vmem = _usable_vmem_bytes()
    x_it = x2d.dtype.itemsize
    w_it = params.wt_padded.dtype.itemsize
    out_it = jnp.dtype(x.dtype).itemsize
    resident_est = (2 * tm * kp * x_it + 2 * tm * np_ * out_it
                    + kp * np_ * w_it + 8 * np_ * 4)
    use_tiled = force_nk_tiling or resident_est > (3 * usable_vmem) // 4

    if use_tiled:
        out = _call_tiled(x2d, params.wt_padded, params.b_padded, x.dtype,
                          tm, tn, tk, usable_vmem)
    else:
        try:
            out = _call_resident(x2d, params.wt_padded, params.b_padded, x.dtype,
                                 tm, usable_vmem, single_buffer_consts=True)
        except Exception:
            # pl.Buffered(1) hint rejected by this JAX/Mosaic version: retry
            # with default (double-buffered) constant blocks.
            out = _call_resident(x2d, params.wt_padded, params.b_padded, x.dtype,
                                 tm, usable_vmem, single_buffer_consts=False)

    out = out[:tokens, :h_out]
    return out.reshape(*orig_shape[:-1], h_out)


# -------------------------------- test --------------------------------------

if __name__ == "__main__":
    HID = 32            # cfg.sigurdsson_hid_size
    BATCH, SEQ = 2, 8

    key = jax.random.PRNGKey(0)
    kx, kw, kb = jax.random.split(key, 3)

    x = jax.random.normal(kx, (BATCH, SEQ, HID), dtype=jnp.float32)
    # Deterministic synthetic parameters (nn.Linear(H, H), PyTorch layout).
    weight = jax.random.normal(kw, (HID, HID), dtype=jnp.float32) * (1.0 / math.sqrt(HID))
    bias = jax.random.normal(kb, (HID,), dtype=jnp.float32) * 0.01

    params = prepare_adapt_params(weight, bias)      # one-time prep
    y_ref = x @ weight.T + bias                      # fp32 reference

    # bf16 weights / bf16 MXU inputs with fp32 accumulation -> relaxed tol.
    TOL = dict(atol=3e-2, rtol=3e-2)

    # 1) Default path: this AdaptLayer size (H=32, 16 tokens) is tiny, so the
    #    wrapper falls back to plain XLA (Pallas would be pure overhead).
    y_fb = adapt_layer(x, params)
    jax.block_until_ready(y_fb)
    assert y_fb.shape == (BATCH, SEQ, HID)
    assert jnp.allclose(y_fb, y_ref, **TOL)

    # 2) Force the Pallas resident-weight kernel.
    y_pl = adapt_layer(x, params, force_pallas=True)
    jax.block_until_ready(y_pl)
    assert y_pl.shape == (BATCH, SEQ, HID)
    assert jnp.allclose(y_pl, y_ref, **TOL)

    # 3) Force the N/K-tiled reduction kernel (the large-H / v7x path).
    y_tl = adapt_layer(x, params, force_pallas=True, force_nk_tiling=True)
    jax.block_until_ready(y_tl)
    assert y_tl.shape == (BATCH, SEQ, HID)
    assert jnp.allclose(y_tl, y_ref, **TOL)

    print("KERNEL_OK")
</pallas_src>

<mosaic_0001>
module attributes {stable_mosaic.version = 11 : i64} {
  func.func @_adapt_kernel_resident(%arg0: i32, %arg1: memref<16x128xf32, #tpu.memory_space<vmem>>, %arg2: memref<128x128xbf16, #tpu.memory_space<vmem>>, %arg3: memref<1x128xf32, #tpu.memory_space<vmem>>, %arg4: memref<16x128xf32, #tpu.memory_space<vmem>>) attributes {dimension_semantics = [#tpu.dimension_semantics<parallel>], iteration_bounds = array<i64: 1>, scalar_prefetch = 0 : i64, scratch_operands = 0 : i64, tpu.core_type = #tpu.core_type<tc>, window_params = [{transform_indices = @transform_0, window_bounds = array<i64: 16, 128>}, {pipeline_mode = #tpu.pipeline_mode<synchronous>, transform_indices = @transform_1, window_bounds = array<i64: 128, 128>}, {pipeline_mode = #tpu.pipeline_mode<synchronous>, transform_indices = @transform_2, window_bounds = array<i64: 1, 128>}, {transform_indices = @transform_3, window_bounds = array<i64: 16, 128>}]} {
    %c0 = arith.constant 0 : index
    %c0_0 = arith.constant 0 : index
    %0 = vector.load %arg1[%c0, %c0_0] : memref<16x128xf32, #tpu.memory_space<vmem>>, vector<16x128xf32>
    %1 = arith.truncf %0 : vector<16x128xf32> to vector<16x128xbf16>
    %c0_1 = arith.constant 0 : index
    %c0_2 = arith.constant 0 : index
    %2 = vector.load %arg2[%c0_1, %c0_2] : memref<128x128xbf16, #tpu.memory_space<vmem>>, vector<128x128xbf16>
    %cst = arith.constant dense<0.000000e+00> : vector<16x128xf32>
    %3 = tpu.matmul %1, %2, %cst {dimension_numbers = #tpu.dot_dimension_numbers<[1], [0], [0], [1], [0, 0, 1, 1], [], []>} : vector<16x128xbf16>, vector<128x128xbf16>, vector<16x128xf32> -> vector<16x128xf32>
    %c0_3 = arith.constant 0 : index
    %c0_4 = arith.constant 0 : index
    %4 = vector.load %arg3[%c0_3, %c0_4] : memref<1x128xf32, #tpu.memory_space<vmem>>, vector<1x128xf32>
    %5 = vector.broadcast %4 : vector<1x128xf32> to vector<16x128xf32>
    %6 = arith.addf %3, %5 : vector<16x128xf32>
    %c0_5 = arith.constant 0 : index
    %c0_6 = arith.constant 0 : index
    %7 = vector.load %arg4[%c0_5, %c0_6] : memref<16x128xf32, #tpu.memory_space<vmem>>, vector<16x128xf32>
    tpu.vector_store %arg4[%c0_5, %c0_6], %6 {strides = array<i32>} : memref<16x128xf32, #tpu.memory_space<vmem>>, vector<16x128xf32>,
    return
  }
  func.func @transform_0(%arg0: i32) -> (i32, i32) {
    %c0_i32 = arith.constant 0 : i32
    %c0_i32_0 = arith.constant 0 : i32
    return %arg0, %c0_i32 : i32, i32
  }
  func.func @transform_1(%arg0: i32) -> (i32, i32) {
    %c0_i32 = arith.constant 0 : i32
    %c0_i32_0 = arith.constant 0 : i32
    %c0_i32_1 = arith.constant 0 : i32
    return %c0_i32, %c0_i32_0 : i32, i32
  }
  func.func @transform_2(%arg0: i32) -> (i32, i32) {
    %c0_i32 = arith.constant 0 : i32
    %c0_i32_0 = arith.constant 0 : i32
    %c0_i32_1 = arith.constant 0 : i32
    return %c0_i32, %c0_i32_0 : i32, i32
  }
  func.func @transform_3(%arg0: i32) -> (i32, i32) {
    %c0_i32 = arith.constant 0 : i32
    %c0_i32_0 = arith.constant 0 : i32
    return %arg0, %c0_i32 : i32, i32
  }
}

module attributes {stable_mosaic.version = 11 : i64} {
  func.func @_adapt_kernel_resident(%arg0: i32, %arg1: memref<16x128xf32, #tpu.memory_space<vmem>>, %arg2: memref<128x128xbf16, #tpu.memory_space<vmem>>, %arg3: memref<1x128xf32, #tpu.memory_space<vmem>>, %arg4: memref<16x128xf32, #tpu.memory_space<vmem>>) attributes {dimension_semantics = [#tpu.dimension_semantics<parallel>], iteration_bounds = array<i64: 1>, scalar_prefetch = 0 : i64, scratch_operands = 0 : i64, tpu.core_type = #tpu.core_type<tc>, window_params = [{transform_indices = @transform_0, window_bounds = array<i64: 16, 128>}, {pipeline_mode = #tpu.pipeline_mode<synchronous>, transform_indices = @transform_1, window_bounds = array<i64: 128, 128>}, {pipeline_mode = #tpu.pipeline_mode<synchronous>, transform_indices = @transform_2, window_bounds = array<i64: 1, 128>}, {transform_indices = @transform_3, window_bounds = array<i64: 16, 128>}]} {
    %c0 = arith.constant 0 : index
    %c0_0 = arith.constant 0 : index
    %0 = vector.load %arg1[%c0, %c0_0] : memref<16x128xf32, #tpu.memory_space<vmem>>, vector<16x128xf32>
    %1 = arith.truncf %0 : vector<16x128xf32> to vector<16x128xbf16>
    %c0_1 = arith.constant 0 : index
    %c0_2 = arith.constant 0 : index
    %2 = vector.load %arg2[%c0_1, %c0_2] : memref<128x128xbf16, #tpu.memory_space<vmem>>, vector<128x128xbf16>
    %cst = arith.constant dense<0.000000e+00> : vector<16x128xf32>
    %3 = tpu.matmul %1, %2, %cst {dimension_numbers = #tpu.dot_dimension_numbers<[1], [0], [0], [1], [0, 0, 1, 1], [], []>} : vector<16x128xbf16>, vector<128x128xbf16>, vector<16x128xf32> -> vector<16x128xf32>
    %c0_3 = arith.constant 0 : index
    %c0_4 = arith.constant 0 : index
    %4 = vector.load %arg3[%c0_3, %c0_4] : memref<1x128xf32, #tpu.memory_space<vmem>>, vector<1x128xf32>
    %5 = vector.broadcast %4 : vector<1x128xf32> to vector<16x128xf32>
    %6 = arith.addf %3, %5 : vector<16x128xf32>
    %c0_5 = arith.constant 0 : index
    %c0_6 = arith.constant 0 : index
    %7 = vector.load %arg4[%c0_5, %c0_6] : memref<16x128xf32, #tpu.memory_space<vmem>>, vector<16x128xf32>
    tpu.vector_store %arg4[%c0_5, %c0_6], %6 {strides = array<i32>} : memref<16x128xf32, #tpu.memory_space<vmem>>, vector<16x128xf32>,
    return
  }
  func.func @transform_0(%arg0: i32) -> (i32, i32) {
    %c0_i32 = arith.constant 0 : i32
    %c0_i32_0 = arith.constant 0 : i32
    return %arg0, %c0_i32 : i32, i32
  }
  func.func @transform_1(%arg0: i32) -> (i32, i32) {
    %c0_i32 = arith.constant 0 : i32
    %c0_i32_0 = arith.constant 0 : i32
    %c0_i32_1 = arith.constant 0 : i32
    return %c0_i32, %c0_i32_0 : i32, i32
  }
  func.func @transform_2(%arg0: i32) -> (i32, i32) {
    %c0_i32 = arith.constant 0 : i32
    %c0_i32_0 = arith.constant 0 : i32
    %c0_i32_1 = arith.constant 0 : i32
    return %c0_i32, %c0_i32_0 : i32, i32
  }
  func.func @transform_3(%arg0: i32) -> (i32, i32) {
    %c0_i32 = arith.constant 0 : i32
    %c0_i32_0 = arith.constant 0 : i32
    return %arg0, %c0_i32 : i32, i32
  }
}

</mosaic_0001>

<bundles_post_ra>
// kernel: tpu_custom_call.1
= control target key start
LH: loop header
LB: loop body
LE: loop exit
PB: predicated region body
PF: predicated region fallthrough
CT: control target
= control target key end

     0   :  { %8 = vsyncpa [#allocation3], 0  ;;  %s380_s0 = inlined_call_operand.hbm [shape: f32[16,128], index: 0, kind: input, shape index: {}]   ;;  %s381_s1 = inlined_call_operand.hbm [shape: bf16[128,128], index: 1, kind: input, shape index: {}]   ;;  %s382_s2 = inlined_call_operand.vmem [shape: f32[1,128], index: 2, kind: input, shape index: {}]   ;;  %s383_s3 = inlined_call_operand.hbm [shape: f32[16,128], index: 3, kind: output, shape index: {}]  }
   0x1   :  { %9 = vsyncpa [#allocation6], 0 }
   0x2   :  { %10 = vsyncpa [#allocation4], 0  ;;  %s306_s12 = smov [#allocation2]   ;;  %s234_s16 = scalar_lea.hbm %s380_s0, 256 }
   0x3   :  { %s16_s13 = sshll.u32 %s306_s12, 4  ;;  %p235_p0 = scmp.ne.s32.totalorder %s380_s0, %s234_s16  ;;  %s17_s13 = int_to_ptr.vmem [resolvable:$true] %s16_s13 }
   0x4   :  { %p238_p1 = scmp.lt.u32.totalorder %s234_s16, %s380_s0 }
   0x6   :  { %p240_p2 = pnand %p238_p1, %p235_p0 }
   0x8   :  { %243 = shalt.err (!%p240_p2)
}
   0x9   :  { %s244_s21 = scalar_lea.vmem %s17_s13, 256  ;;  %p249_p4 = scmp.lt.s32.totalorder %s17_s13, %s17_s13 }
   0xa   :  { %p245_p3 = scmp.ne.s32.totalorder %s17_s13, %s244_s21  ;;  %p250_p5 = scmp.lt.s32.totalorder %s244_s21, %s244_s21 }
   0xc   :  { %p251_p6 = por %p250_p5, %p249_p4 }
   0xe   :  { %p252_p7 = pnand %p251_p6, %p245_p3 }
  0x10   :  { %255 = shalt.err (!%p252_p7)
}
  0x11   :  { %s307_s22 = smov 128   ;;  %s308_s23 = smov 8  }
  0x12   :  { %22 = dma.hbm_to_vmem [thread:$0]  %s380_s0, 256, %s17_s13, [#allocation3], %s307_s22, %s307_s22, %s308_s23  }
  0x13   :  { %s309_s26 = smov [#allocation5]   ;;  %s256_s30 = scalar_lea.hbm %s381_s1, 1024 }
  0x14   :  { %s28_s27 = sshll.u32 %s309_s26, 4  ;;  %p257_p8 = scmp.ne.s32.totalorder %s381_s1, %s256_s30  ;;  %s29_s27 = int_to_ptr.vmem [resolvable:$true] %s28_s27 }
  0x15   :  { %p260_p9 = scmp.lt.u32.totalorder %s256_s30, %s381_s1 }
  0x17   :  { %p262_p10 = pnand %p260_p9, %p257_p8 }
  0x19   :  { %265 = shalt.err (!%p262_p10)
}
  0x1a   :  { %s266_s8 = scalar_lea.vmem %s29_s27, 1024  ;;  %p271_p12 = scmp.lt.s32.totalorder %s29_s27, %s29_s27 }
  0x1b   :  { %p267_p11 = scmp.ne.s32.totalorder %s29_s27, %s266_s8  ;;  %p272_p13 = scmp.lt.s32.totalorder %s266_s8, %s266_s8 }
  0x1d   :  { %p273_p0 = por %p272_p13, %p271_p12 }
  0x1f   :  { %p274_p1 = pnand %p273_p0, %p267_p11 }
  0x21   :  { %277 = shalt.err (!%p274_p1)
}
  0x22   :  { %s310_s0 = smov 64   ;;  %s311_s9 = smov 4  }
  0x23   :  { %34 = dma.hbm_to_vmem [thread:$0]  %s381_s1, 1024, %s29_s27, [#allocation6], %s310_s0, %s310_s0, %s311_s9  }
  0x24   :  { %300 = dma.done.wait [#allocation3], 256  }
  0x25   :  { %301 = vsyncadd [#allocation3], 4294967040 }
  0x26   :  { %302 = dma.done.wait [#allocation6], 1024  }
  0x27   :  { %303 = vsyncadd [#allocation6], 4294966272  ;;  %v312_v0 = vmov 0.0   ;;  %vm313_vm0 = vmmov 0   ;;  %v226_v1 = vld [vmem:[#allocation5] sm:$0xff]   ;;  %v227_v2 = vld [vmem:[#allocation5 + $0x8] sm:$0xff]  }
  0x28   :  { %197 = vmatprep.subr.bf16.mxu0 %v312_v0  ;;  %213 = vmatprep.mubr.msk.bf16.mxu0 %vm313_vm0, %v312_v0  ;;  %v228_v3 = vld [vmem:[#allocation5 + $0x10] sm:$0xff]   ;;  %v229_v4 = vld [vmem:[#allocation5 + $0x18] sm:$0xff]   ;;  %v230_v5 = vld [vmem:[#allocation5 + $0x20] sm:$0xff]   ;;  %s314_s13 = smov [#allocation7]  }
  0x29   :  { %198 = vmatpush3.bf16.msra.mxu0 %v226_v1  ;;  %v231_v6 = vld [vmem:[#allocation5 + $0x28] sm:$0xff]   ;;  %v232_v7 = vld [vmem:[#allocation5 + $0x30] sm:$0xff]   ;;  %v233_v8 = vld [vmem:[#allocation5 + $0x38] sm:$0xff]   ;;  %s166_s14 = sshll.u32 %s314_s13, 4  ;;  %s167_s14 = int_to_ptr.vmem [resolvable:$true] %s166_s14 }
  0x2a   :  { %199 = vmatprep.subr.bf16.mxu0 %v312_v0  ;;  %v44_v9 = vld [vmem:[#allocation2] sm:$0xff]  ;;  %v45_v10 = vld [vmem:[#allocation2 + $0x8] sm:$0xff]  ;;  %s278_s15 = scalar_lea.vmem %s167_s14, 256  ;;  %p283_p3 = scmp.lt.s32.totalorder %s167_s14, %s167_s14 }
  0x2b   :  { %v46_v11 = vpack.c.bf16 %v45_v10, %v44_v9  ;;  %v179_v12 = vld [vmem:[%s382_s2] ss:$0 sm:$0xff]  ;;  %p279_p2 = scmp.ne.s32.totalorder %s167_s14, %s278_s15  ;;  %p284_p4 = scmp.lt.s32.totalorder %s278_s15, %s278_s15 }
  0x2d   :  { %200 = vmatpush3.bf16.msra.mxu0 %v227_v2  ;;  %p285_p5 = por %p284_p4, %p283_p3 }
  0x2e   :  { %201 = vmatprep.subr.bf16.mxu0 %v312_v0 }
  0x2f   :  { %p286_p6 = pnand %p285_p5, %p279_p2 }
  0x31   :  { %202 = vmatpush3.bf16.msra.mxu0 %v228_v3 }
  0x32   :  { %203 = vmatprep.subr.bf16.mxu0 %v312_v0 }
  0x35   :  { %204 = vmatpush3.bf16.msra.mxu0 %v229_v4 }
  0x36   :  { %205 = vmatprep.subr.bf16.mxu0 %v312_v0 }
  0x39   :  { %206 = vmatpush3.bf16.msra.mxu0 %v230_v5 }
  0x3a   :  { %207 = vmatprep.subr.bf16.mxu0 %v312_v0 }
  0x3d   :  { %208 = vmatpush3.bf16.msra.mxu0 %v231_v6 }
  0x3e   :  { %209 = vmatprep.subr.bf16.mxu0 %v312_v0 }
  0x41   :  { %210 = vmatpush3.bf16.msra.mxu0 %v232_v7 }
  0x42   :  { %211 = vmatprep.subr.bf16.mxu0 %v312_v0 }
  0x45   :  { %212 = vmatpush3.bf16.msra.mxu0 %v233_v8 }
  0x48   :  { %214 = vmatmul.mubr.bf16.vlgmr.msra.gmra.mrb[0].mxu0 %v46_v11 }
 0x11b   :  { %v152_v13 = vpop.f32.mrb[0].mxu0 }
 0x11c   :  { %v153_v14 = vadd.f32 %v179_v12, %v152_v13  ;;  %v215_v15 = vpop.f32.mrb[1].mxu0 }
 0x11d   :  { %v155_v16 = vpop.f32.mrb[2].mxu0 }
 0x11e   :  { %159 = vst [vmem:[#allocation7] sm:$0xff] %v153_v14  ;;  %v156_v17 = vadd.f32 %v179_v12, %v155_v16  ;;  %v216_v18 = vpop.f32.mrb[3].mxu0 }
 0x120   :  { %160 = vst [vmem:[#allocation7 + $0x8] sm:$0xff] %v156_v17 }
 0x121   :  { %289 = shalt.err (!%p286_p6)
}
 0x122   :  { %s290_s17 = scalar_lea.hbm %s383_s3, 256 }
 0x123   :  { %p291_p7 = scmp.ne.s32.totalorder %s383_s3, %s290_s17  ;;  %p294_p8 = scmp.lt.u32.totalorder %s290_s17, %s383_s3 }
 0x125   :  { %p296_p9 = pnand %p294_p8, %p291_p7 }
 0x127   :  { %299 = shalt.err (!%p296_p9)
}
 0x128   :  { %172 = dma.vmem_to_hbm [thread:$0]  %s167_s14, 256, %s383_s3, [#allocation4], %s307_s22, %s307_s22, %s308_s23  }
 0x129   :  { %304 = dma.done.wait [#allocation4], 256  }
 0x12a   :  { %305 = vsyncadd [#allocation4], 4294967040 }
 0x12b   :  { %176 = vsyncpa [#allocation3], 1 }
 0x12c   :  { %177 = vsyncpa [#allocation6], 1 }
 0x12d   :  { %178 = vsyncpa [#allocation4], 1 }

// kernel: tpu_custom_call.1
= control target key start
LH: loop header
LB: loop body
LE: loop exit
PB: predicated region body
PF: predicated region fallthrough
CT: control target
= control target key end

     0   :  { %8 = vsyncpa [#allocation3], 0  ;;  %s380_s0 = inlined_call_operand.hbm [shape: f32[16,128], index: 0, kind: input, shape index: {}]   ;;  %s381_s1 = inlined_call_operand.hbm [shape: bf16[128,128], index: 1, kind: input, shape index: {}]   ;;  %s382_s2 = inlined_call_operand.vmem [shape: f32[1,128], index: 2, kind: input, shape index: {}]   ;;  %s383_s3 = inlined_call_operand.hbm [shape: f32[16,128], index: 3, kind: output, shape index: {}]  }
   0x1   :  { %9 = vsyncpa [#allocation6], 0 }
   0x2   :  { %10 = vsyncpa [#allocation4], 0  ;;  %s306_s12 = smov [#allocation2]   ;;  %s234_s16 = scalar_lea.hbm %s380_s0, 256 }
   0x3   :  { %s16_s13 = sshll.u32 %s306_s12, 4  ;;  %p235_p0 = scmp.ne.s32.totalorder %s380_s0, %s234_s16  ;;  %s17_s13 = int_to_ptr.vmem [resolvable:$true] %s16_s13 }
   0x4   :  { %p238_p1 = scmp.lt.u32.totalorder %s234_s16, %s380_s0 }
   0x6   :  { %p240_p2 = pnand %p238_p1, %p235_p0 }
   0x8   :  { %243 = shalt.err (!%p240_p2)
}
   0x9   :  { %s244_s21 = scalar_lea.vmem %s17_s13, 256  ;;  %p249_p4 = scmp.lt.s32.totalorder %s17_s13, %s17_s13 }
   0xa   :  { %p245_p3 = scmp.ne.s32.totalorder %s17_s13, %s244_s21  ;;  %p250_p5 = scmp.lt.s32.totalorder %s244_s21, %s244_s21 }
   0xc   :  { %p251_p6 = por %p250_p5, %p249_p4 }
   0xe   :  { %p252_p7 = pnand %p251_p6, %p245_p3 }
  0x10   :  { %255 = shalt.err (!%p252_p7)
}
  0x11   :  { %s307_s22 = smov 128   ;;  %s308_s23 = smov 8  }
  0x12   :  { %22 = dma.hbm_to_vmem [thread:$0]  %s380_s0, 256, %s17_s13, [#allocation3], %s307_s22, %s307_s22, %s308_s23  }
  0x13   :  { %s309_s26 = smov [#allocation5]   ;;  %s256_s30 = scalar_lea.hbm %s381_s1, 1024 }
  0x14   :  { %s28_s27 = sshll.u32 %s309_s26, 4  ;;  %p257_p8 = scmp.ne.s32.totalorder %s381_s1, %s256_s30  ;;  %s29_s27 = int_to_ptr.vmem [resolvable:$true] %s28_s27 }
  0x15   :  { %p260_p9 = scmp.lt.u32.totalorder %s256_s30, %s381_s1 }
  0x17   :  { %p262_p10 = pnand %p260_p9, %p257_p8 }
  0x19   :  { %265 = shalt.err (!%p262_p10)
}
  0x1a   :  { %s266_s8 = scalar_lea.vmem %s29_s27, 1024  ;;  %p271_p12 = scmp.lt.s32.totalorder %s29_s27, %s29_s27 }
  0x1b   :  { %p267_p11 = scmp.ne.s32.totalorder %s29_s27, %s266_s8  ;;  %p272_p13 = scmp.lt.s32.totalorder %s266_s8, %s266_s8 }
  0x1d   :  { %p273_p0 = por %p272_p13, %p271_p12 }
  0x1f   :  { %p274_p1 = pnand %p273_p0, %p267_p11 }
  0x21   :  { %277 = shalt.err (!%p274_p1)
}
  0x22   :  { %s310_s0 = smov 64   ;;  %s311_s9 = smov 4  }
  0x23   :  { %34 = dma.hbm_to_vmem [thread:$0]  %s381_s1, 1024, %s29_s27, [#allocation6], %s310_s0, %s310_s0, %s311_s9  }
  0x24   :  { %300 = dma.done.wait [#allocation3], 256  }
  0x25   :  { %301 = vsyncadd [#allocation3], 4294967040 }
  0x26   :  { %302 = dma.done.wait [#allocation6], 1024  }
  0x27   :  { %303 = vsyncadd [#allocation6], 4294966272  ;;  %v312_v0 = vmov 0.0   ;;  %vm313_vm0 = vmmov 0   ;;  %v226_v1 = vld [vmem:[#allocation5] sm:$0xff]   ;;  %v227_v2 = vld [vmem:[#allocation5 + $0x8] sm:$0xff]  }
  0x28   :  { %197 = vmatprep.subr.bf16.mxu0 %v312_v0  ;;  %213 = vmatprep.mubr.msk.bf16.mxu0 %vm313_vm0, %v312_v0  ;;  %v228_v3 = vld [vmem:[#allocation5 + $0x10] sm:$0xff]   ;;  %v229_v4 = vld [vmem:[#allocation5 + $0x18] sm:$0xff]   ;;  %v230_v5 = vld [vmem:[#allocation5 + $0x20] sm:$0xff]   ;;  %s314_s13 = smov [#allocation7]  }
  0x29   :  { %198 = vmatpush3.bf16.msra.mxu0 %v226_v1  ;;  %v231_v6 = vld [vmem:[#allocation5 + $0x28] sm:$0xff]   ;;  %v232_v7 = vld [vmem:[#allocation5 + $0x30] sm:$0xff]   ;;  %v233_v8 = vld [vmem:[#allocation5 + $0x38] sm:$0xff]   ;;  %s166_s14 = sshll.u32 %s314_s13, 4  ;;  %s167_s14 = int_to_ptr.vmem [resolvable:$true] %s166_s14 }
  0x2a   :  { %199 = vmatprep.subr.bf16.mxu0 %v312_v0  ;;  %v44_v9 = vld [vmem:[#allocation2] sm:$0xff]  ;;  %v45_v10 = vld [vmem:[#allocation2 + $0x8] sm:$0xff]  ;;  %s278_s15 = scalar_lea.vmem %s167_s14, 256  ;;  %p283_p3 = scmp.lt.s32.totalorder %s167_s14, %s167_s14 }
  0x2b   :  { %v46_v11 = vpack.c.bf16 %v45_v10, %v44_v9  ;;  %v179_v12 = vld [vmem:[%s382_s2] ss:$0 sm:$0xff]  ;;  %p279_p2 = scmp.ne.s32.totalorder %s167_s14, %s278_s15  ;;  %p284_p4 = scmp.lt.s32.totalorder %s278_s15, %s278_s15 }
  0x2d   :  { %200 = vmatpush3.bf16.msra.mxu0 %v227_v2  ;;  %p285_p5 = por %p284_p4, %p283_p3 }
  0x2e   :  { %201 = vmatprep.subr.bf16.mxu0 %v312_v0 }
  0x2f   :  { %p286_p6 = pnand %p285_p5, %p279_p2 }
  0x31   :  { %202 = vmatpush3.bf16.msra.mxu0 %v228_v3 }
  0x32   :  { %203 = vmatprep.subr.bf16.mxu0 %v312_v0 }
  0x35   :  { %204 = vmatpush3.bf16.msra.mxu0 %v229_v4 }
  0x36   :  { %205 = vmatprep.subr.bf16.mxu0 %v312_v0 }
  0x39   :  { %206 = vmatpush3.bf16.msra.mxu0 %v230_v5 }
  0x3a   :  { %207 = vmatprep.subr.bf16.mxu0 %v312_v0 }
  0x3d   :  { %208 = vmatpush3.bf16.msra.mxu0 %v231_v6 }
  0x3e   :  { %209 = vmatprep.subr.bf16.mxu0 %v312_v0 }
  0x41   :  { %210 = vmatpush3.bf16.msra.mxu0 %v232_v7 }
  0x42   :  { %211 = vmatprep.subr.bf16.mxu0 %v312_v0 }
  0x45   :  { %212 = vmatpush3.bf16.msra.mxu0 %v233_v8 }
  0x48   :  { %214 = vmatmul.mubr.bf16.vlgmr.msra.gmra.mrb[0].mxu0 %v46_v11 }
 0x11b   :  { %v152_v13 = vpop.f32.mrb[0].mxu0 }
 0x11c   :  { %v153_v14 = vadd.f32 %v179_v12, %v152_v13  ;;  %v215_v15 = vpop.f32.mrb[1].mxu0 }
 0x11d   :  { %v155_v16 = vpop.f32.mrb[2].mxu0 }
 0x11e   :  { %159 = vst [vmem:[#allocation7] sm:$0xff] %v153_v14  ;;  %v156_v17 = vadd.f32 %v179_v12, %v155_v16  ;;  %v216_v18 = vpop.f32.mrb[3].mxu0 }
 0x120   :  { %160 = vst [vmem:[#allocation7 + $0x8] sm:$0xff] %v156_v17 }
 0x121   :  { %289 = shalt.err (!%p286_p6)
}
 0x122   :  { %s290_s17 = scalar_lea.hbm %s383_s3, 256 }
 0x123   :  { %p291_p7 = scmp.ne.s32.totalorder %s383_s3, %s290_s17  ;;  %p294_p8 = scmp.lt.u32.totalorder %s290_s17, %s383_s3 }
 0x125   :  { %p296_p9 = pnand %p294_p8, %p291_p7 }
 0x127   :  { %299 = shalt.err (!%p296_p9)
}
 0x128   :  { %172 = dma.vmem_to_hbm [thread:$0]  %s167_s14, 256, %s383_s3, [#allocation4], %s307_s22, %s307_s22, %s308_s23  }
 0x129   :  { %304 = dma.done.wait [#allocation4], 256  }
 0x12a   :  { %305 = vsyncadd [#allocation4], 4294967040 }
 0x12b   :  { %176 = vsyncpa [#allocation3], 1 }
 0x12c   :  { %177 = vsyncpa [#allocation6], 1 }
 0x12d   :  { %178 = vsyncpa [#allocation4], 1 }

</bundles_post_ra>
